<compile_context>
chip_gen: v7x
topology: tpu7x:2x2x1
jax: 0.10.0
libtpu: 0.0.40
codegen_flags: <defaults>
</compile_context>

<pallas_src>
import jax
import jax.numpy as jnp
from jax.experimental import pallas as pl
from jax.experimental.pallas import tpu as pltpu


def _round_up(x, m):
    return ((x + m - 1) // m) * m


def _centroid_sse_kernel(emb_ref, cen_ref, mask_ref, out_ref):
    # emb_ref / cen_ref: (TM, Dp) f32 tiles; mask_ref: (TM, 1) f32 (1.0 = old class)
    diff = emb_ref[...] - cen_ref[...]
    sq = diff * diff * mask_ref[...]                 # masked squared error
    # Sublane-only reduction; keep the output lane-dense and leave the final
    # (tiny) cross-lane / cross-block reduction to the wrapper.
    partial = jnp.sum(sq, axis=0, keepdims=True)     # (1, Dp)
    out_ref[...] = partial[None]                     # (1, 1, Dp)


def distillation_loss_centroid(embeddings, labels, centroids, old_classes):
    """Pallas-TPU equivalent of DistillationLoss_Centroid.forward()."""
    embeddings = jnp.asarray(embeddings, dtype=jnp.float32)
    centroids = jnp.asarray(centroids, dtype=jnp.float32)
    labels = jnp.asarray(labels, dtype=jnp.int32)
    old = jnp.asarray(old_classes, dtype=jnp.int32).reshape(-1)

    n, d = embeddings.shape
    c = centroids.shape[0]

    # Scalar-side prep (cheap O(N) / O(N*K) work, kept out of the kernel):
    mask = jnp.any(labels[:, None] == old[None, :], axis=-1)      # (N,) bool
    count = jnp.sum(mask.astype(jnp.float32))                     # scalar
    safe_lab = jnp.clip(labels, 0, c - 1)                         # OOB-safe; masked anyway
    targets = jnp.take(centroids, safe_lab, axis=0)               # (N, D) gather

    # TPU-friendly padding: lanes -> multiple of 128, rows -> row-tile size.
    dp = _round_up(d, 128)
    tm = min(256, _round_up(n, 8))
    n_pad = _round_up(n, tm)
    num_blocks = n_pad // tm

    emb_p = jnp.zeros((n_pad, dp), jnp.float32).at[:n, :d].set(embeddings)
    cen_p = jnp.zeros((n_pad, dp), jnp.float32).at[:n, :d].set(targets)
    mask_p = jnp.zeros((n_pad, 1), jnp.float32).at[:n, 0].set(mask.astype(jnp.float32))

    partials = pl.pallas_call(
        _centroid_sse_kernel,
        out_shape=jax.ShapeDtypeStruct((num_blocks, 1, dp), jnp.float32),
        grid=(num_blocks,),
        in_specs=[
            pl.BlockSpec((tm, dp), lambda i: (i, 0)),   # embeddings tile
            pl.BlockSpec((tm, dp), lambda i: (i, 0)),   # gathered centroids tile
            pl.BlockSpec((tm, 1), lambda i: (i, 0)),    # old-class mask column
        ],
        out_specs=pl.BlockSpec((1, 1, dp), lambda i: (i, 0, 0)),
        compiler_params=pltpu.CompilerParams(
            dimension_semantics=("parallel",),
        ),
    )(emb_p, cen_p, mask_p)

    total_sq = jnp.sum(partials)                        # tiny cross-block reduce
    denom = jnp.maximum(count, 1.0) * jnp.float32(d)    # per-sample mse = sum / D
    return jnp.where(count > 0, total_sq / denom, jnp.float32(0.0))


def _reference_loss(embeddings, labels, centroids, old_classes):
    """Plain numpy/python loop mirroring the PyTorch module exactly."""
    emb = jax.device_get(embeddings)
    lab = jax.device_get(labels)
    cen = jax.device_get(centroids)
    old = set(int(x) for x in old_classes)
    total, count = 0.0, 0
    for i in range(emb.shape[0]):
        li = int(lab[i])
        if li in old:
            diff = emb[i] - cen[li]
            total += float((diff * diff).mean())
            count += 1
    return total / count if count > 0 else 0.0


if __name__ == "__main__":
    key = jax.random.PRNGKey(0)
    k_emb, k_lab, k_cen = jax.random.split(key, 3)

    N, D, C = 8, 32, 6
    old_classes = [0, 1, 2]

    embeddings = jax.random.normal(k_emb, (N, D), dtype=jnp.float32)
    labels = jax.random.randint(k_lab, (N,), 0, C, dtype=jnp.int32)
    labels = labels.at[0].set(0)  # guarantee at least one old-class sample
    centroids = jax.random.normal(k_cen, (C, D), dtype=jnp.float32)

    loss = distillation_loss_centroid(embeddings, labels, centroids, old_classes)
    loss = jax.block_until_ready(loss)

    ref = _reference_loss(embeddings, labels, centroids, old_classes)
    assert jnp.allclose(loss, ref, rtol=1e-5, atol=1e-5), (float(loss), ref)

    # count == 0 path: no label belongs to the old classes -> loss must be 0.
    empty = distillation_loss_centroid(embeddings, labels, centroids, [C + 7])
    empty = jax.block_until_ready(empty)
    assert jnp.allclose(empty, 0.0), float(empty)

    print("KERNEL_OK")
</pallas_src>

<mosaic_0001>
module attributes {stable_mosaic.version = 11 : i64} {
  func.func @_centroid_sse_kernel(%arg0: i32, %arg1: memref<8x128xf32, #tpu.memory_space<vmem>>, %arg2: memref<8x128xf32, #tpu.memory_space<vmem>>, %arg3: memref<8x1xf32, #tpu.memory_space<vmem>>, %arg4: memref<1x1x128xf32, #tpu.memory_space<vmem>>) attributes {dimension_semantics = [#tpu.dimension_semantics<parallel>], iteration_bounds = array<i64: 1>, scalar_prefetch = 0 : i64, scratch_operands = 0 : i64, tpu.core_type = #tpu.core_type<tc>, window_params = [{transform_indices = @transform_0, window_bounds = array<i64: 8, 128>}, {transform_indices = @transform_1, window_bounds = array<i64: 8, 128>}, {transform_indices = @transform_2, window_bounds = array<i64: 8, 1>}, {transform_indices = @transform_3, window_bounds = array<i64: 1, 1, 128>}]} {
    %c0 = arith.constant 0 : index
    %c0_0 = arith.constant 0 : index
    %0 = vector.load %arg1[%c0, %c0_0] : memref<8x128xf32, #tpu.memory_space<vmem>>, vector<8x128xf32>
    %c0_1 = arith.constant 0 : index
    %c0_2 = arith.constant 0 : index
    %1 = vector.load %arg2[%c0_1, %c0_2] : memref<8x128xf32, #tpu.memory_space<vmem>>, vector<8x128xf32>
    %2 = arith.subf %0, %1 : vector<8x128xf32>
    %3 = arith.mulf %2, %2 : vector<8x128xf32>
    %c0_3 = arith.constant 0 : index
    %c0_4 = arith.constant 0 : index
    %4 = vector.load %arg3[%c0_3, %c0_4] : memref<8x1xf32, #tpu.memory_space<vmem>>, vector<8x1xf32>
    %5 = vector.broadcast %4 : vector<8x1xf32> to vector<8x128xf32>
    %6 = arith.mulf %3, %5 : vector<8x128xf32>
    %cst = arith.constant dense<0.000000e+00> : vector<128xf32>
    %7 = vector.multi_reduction <add>, %6, %cst [0] : vector<8x128xf32> to vector<128xf32>
    %8 = vector.shape_cast %7 : vector<128xf32> to vector<1x128xf32>
    %9 = vector.shape_cast %8 : vector<1x128xf32> to vector<1x1x128xf32>
    %c0_5 = arith.constant 0 : index
    %c0_6 = arith.constant 0 : index
    %c0_7 = arith.constant 0 : index
    %10 = vector.load %arg4[%c0_5, %c0_6, %c0_7] : memref<1x1x128xf32, #tpu.memory_space<vmem>>, vector<1x1x128xf32>
    tpu.vector_store %arg4[%c0_5, %c0_6, %c0_7], %9 {strides = array<i32>} : memref<1x1x128xf32, #tpu.memory_space<vmem>>, vector<1x1x128xf32>,
    return
  }
  func.func @transform_0(%arg0: i32) -> (i32, i32) {
    %c0_i32 = arith.constant 0 : i32
    %c0_i32_0 = arith.constant 0 : i32
    return %arg0, %c0_i32 : i32, i32
  }
  func.func @transform_1(%arg0: i32) -> (i32, i32) {
    %c0_i32 = arith.constant 0 : i32
    %c0_i32_0 = arith.constant 0 : i32
    return %arg0, %c0_i32 : i32, i32
  }
  func.func @transform_2(%arg0: i32) -> (i32, i32) {
    %c0_i32 = arith.constant 0 : i32
    %c0_i32_0 = arith.constant 0 : i32
    return %arg0, %c0_i32 : i32, i32
  }
  func.func @transform_3(%arg0: i32) -> (i32, i32, i32) {
    %c0_i32 = arith.constant 0 : i32
    %c0_i32_0 = arith.constant 0 : i32
    %c0_i32_1 = arith.constant 0 : i32
    return %arg0, %c0_i32, %c0_i32_0 : i32, i32, i32
  }
}

</mosaic_0001>

<bundles_post_ra>
// kernel: tpu_custom_call.1
= control target key start
LH: loop header
LB: loop body
LE: loop exit
PB: predicated region body
PF: predicated region fallthrough
CT: control target
= control target key end

     0   :  { %8 = vsyncpa [#allocation3], 0  ;;  %s165_s0 = inlined_call_operand.vmem [shape: f32[8,128], index: 0, kind: input, shape index: {}]   ;;  %s166_s1 = inlined_call_operand.hbm [shape: f32[8,128], index: 1, kind: input, shape index: {}]   ;;  %s167_s2 = inlined_call_operand.vmem [shape: f32[8,1], index: 2, kind: input, shape index: {}]   ;;  %s168_s3 = inlined_call_operand.hbm [shape: f32[1,1,128], index: 3, kind: output, shape index: {}]  }
   0x1   :  { %9 = vsyncpa [#allocation4], 0  ;;  %s112_s12 = smov [#allocation2]   ;;  %s64_s16 = scalar_lea.hbm %s166_s1, 128 }
   0x2   :  { %s18_s13 = sshll.u32 %s112_s12, 4  ;;  %p65_p0 = scmp.ne.s32.totalorder %s166_s1, %s64_s16  ;;  %s19_s13 = int_to_ptr.vmem [resolvable:$true] %s18_s13 }
   0x3   :  { %p68_p1 = scmp.lt.u32.totalorder %s64_s16, %s166_s1 }
   0x5   :  { %p70_p2 = pnand %p68_p1, %p65_p0 }
   0x7   :  { %73 = shalt.err (!%p70_p2)
}
   0x8   :  { %s74_s21 = scalar_lea.vmem %s19_s13, 128  ;;  %p79_p4 = scmp.lt.s32.totalorder %s19_s13, %s19_s13 }
   0x9   :  { %p75_p3 = scmp.ne.s32.totalorder %s19_s13, %s74_s21  ;;  %p80_p5 = scmp.lt.s32.totalorder %s74_s21, %s74_s21 }
   0xb   :  { %p81_p6 = por %p80_p5, %p79_p4 }
   0xd   :  { %p82_p7 = pnand %p81_p6, %p75_p3 }
   0xf   :  { %85 = shalt.err (!%p82_p7)
}
  0x10   :  { %21 = dma.hbm_to_vmem [thread:$0]  %s166_s1, 128, %s19_s13, [#allocation3]  }
  0x11   :  { %108 = dma.done.wait [#allocation3], 128  }
  0x12   :  { %109 = vsyncadd [#allocation3], 4294967168  ;;  %v113_v0 = vmov 0   ;;  %v31_v1 = vld [vmem:[%s167_s2] sm:$0xff]  ;;  %s114_s1 = smov [#allocation5]  }
  0x13   :  { %63 = vset.pattern.permute.xlu0 %v113_v0  ;;  %v27_v2 = vld [vmem:[%s165_s0] sm:$0xff]  ;;  %s51_s28 = sshll.u32 %s114_s1, 4  ;;  %s52_s28 = int_to_ptr.vmem [resolvable:$true] %s51_s28 }
  0x14   :  { %34 = vperm.xlu0 %63, %v31_v1   ;;  %v28_v3 = vld [vmem:[#allocation2] sm:$0xff]  ;;  %s86_s2 = scalar_lea.vmem %s52_s28, 16  ;;  %s90_s29 = scalar_lea.vmem %s52_s28, 32 }
  0x15   :  { %v29_v4 = vsub.f32 %v27_v2, %v28_v3  ;;  %p87_p8 = scmp.ne.s32.totalorder %s52_s28, %s86_s2  ;;  %p91_p9 = scmp.lt.s32.totalorder %s52_s28, %s52_s28 }
  0x16   :  { %p92_p10 = scmp.lt.s32.totalorder %s90_s29, %s86_s2 }
  0x17   :  { %v30_v5 = vmul.f32 %v29_v4, %v29_v4 }
  0x18   :  { %p93_p11 = por %p92_p10, %p91_p9 }
  0x1a   :  { %p94_p12 = pnand %p93_p11, %p87_p8 }
  0x93   :  { %v35_v6 = vpop.permute.xlu0 %34 }
  0x94   :  { %v37_v7 = vmul.f32 %v35_v6, %v30_v5 }
  0x96   :  { %v38_v8 = vrot.slane %v37_v7, 4 }
  0x98   :  { %v39_v9 = vadd.f32 %v38_v8, %v37_v7 }
  0x9a   :  { %v40_v10 = vrot.slane %v39_v9, 2 }
  0x9c   :  { %v41_v11 = vadd.f32 %v40_v10, %v39_v9 }
  0x9e   :  { %v42_v12 = vrot.slane %v41_v11, 1 }
  0xa0   :  { %v43_v13 = vadd.f32 %v42_v12, %v41_v11 }
  0xa2   :  { %44 = vst [vmem:[#allocation5] sm:$0x1] %v43_v13 }
  0xa3   :  { %97 = shalt.err (!%p94_p12)
}
  0xa4   :  { %s98_s4 = scalar_lea.hbm %s168_s3, 16 }
  0xa5   :  { %p99_p13 = scmp.ne.s32.totalorder %s168_s3, %s98_s4  ;;  %p102_p0 = scmp.lt.u32.totalorder %s98_s4, %s168_s3 }
  0xa7   :  { %p104_p1 = pnand %p102_p0, %p99_p13 }
  0xa9   :  { %107 = shalt.err (!%p104_p1)
}
  0xaa   :  { %54 = dma.vmem_to_hbm [thread:$0]  %s52_s28, 16, %s168_s3, [#allocation4]  }
  0xab   :  { %110 = dma.done.wait [#allocation4], 16  }
  0xac   :  { %111 = vsyncadd [#allocation4], 4294967280 }
  0xad   :  { %58 = vsyncpa [#allocation3], 1 }
  0xae   :  { %59 = vsyncpa [#allocation4], 1 }

</bundles_post_ra>
